<compile_context>
chip_gen: v5e
topology: v5e:2x2
jax: 0.10.0
libtpu: 0.0.40
codegen_flags: <defaults>
</compile_context>

<pallas_src>
import functools
import math

import jax
import jax.numpy as jnp
from jax.experimental import pallas as pl
from jax.experimental.pallas import tpu as pltpu

_LANE = 128     # feature dims padded to a multiple of this
_SUBLANE = 8    # f32 sublane count; batch padded to a multiple of this


def _round_up(x, m):
    return ((x + m - 1) // m) * m


def _pick_tile(dim, cap):
    """Largest power-of-two tile <= cap (>= 128) that divides `dim`."""
    t = cap
    while t > _LANE and dim % t != 0:
        t //= 2
    return min(t, dim)


def _pick_batch_tile(bp, cap=256):
    tb = min(bp, cap)
    while bp % tb != 0:
        tb -= _SUBLANE
    return tb


# ---------------------------------------------------------------------------
# Parameter init (matches reset_parameters) and one-time layout preparation.
# ---------------------------------------------------------------------------
def init_layer_params(key, in_dim, out_dim):
    k_w, k_b = jax.random.split(key)
    # kaiming_uniform_(a=sqrt(5)) -> bound = sqrt(6/((1+a^2)*fan_in)) = 1/sqrt(fan_in)
    bound = 1.0 / math.sqrt(in_dim)
    weight_mean = jax.random.uniform(k_w, (out_dim, in_dim), jnp.float32,
                                     minval=-bound, maxval=bound)
    weight_logvar = jnp.full((out_dim, in_dim), -6.0, jnp.float32)
    bias_mean = jax.random.uniform(k_b, (out_dim,), jnp.float32,
                                   minval=-bound, maxval=bound)
    bias_logvar = jnp.full((out_dim,), -6.0, jnp.float32)
    return weight_mean, weight_logvar, bias_mean, bias_logvar


def init_net_params(key, input_dim, hidden_sizes, output_dim):
    dims = [input_dim] + list(hidden_sizes) + [output_dim]
    keys = jax.random.split(key, len(dims) - 1)
    return [init_layer_params(keys[i], dims[i], dims[i + 1])
            for i in range(len(dims) - 1)]


def prepare_layer(wm, wlv, bm, blv):
    """K-major transpose + lane padding + precomputed std (layout plumbing)."""
    out_dim, in_dim = wm.shape
    kp = _round_up(in_dim, _LANE)
    np_ = _round_up(out_dim, _LANE)
    wm_t = jnp.zeros((kp, np_), jnp.float32).at[:in_dim, :out_dim].set(wm.T)
    wstd_t = jnp.zeros((kp, np_), jnp.float32).at[:in_dim, :out_dim].set(
        jnp.exp(0.5 * wlv).T)
    bm_p = jnp.zeros((1, np_), jnp.float32).at[0, :out_dim].set(bm)
    bstd_p = jnp.zeros((1, np_), jnp.float32).at[0, :out_dim].set(
        jnp.exp(0.5 * blv))
    return dict(wm_t=wm_t, wstd_t=wstd_t, bm=bm_p, bstd=bstd_p,
                in_dim=in_dim, out_dim=out_dim, kp=kp, np=np_)


def prepare_net(raw_params):
    return [prepare_layer(*p) for p in raw_params]


def sample_eps(key, prepared):
    """One standard-normal draw per weight / bias element (padded layout)."""
    eps = []
    for li, p in enumerate(prepared):
        kw, kb = jax.random.split(jax.random.fold_in(key, li))
        eps_w = jax.random.normal(kw, (p["kp"], p["np"]), jnp.float32)
        eps_b = jax.random.normal(kb, (1, p["np"]), jnp.float32)
        eps.append((eps_w, eps_b))
    return eps


# ---------------------------------------------------------------------------
# Fused whole-network kernel (all layers resident in VMEM).
# ---------------------------------------------------------------------------
def _make_fused_kernel(n_layers, sample):
    per = 6 if sample else 2

    def kernel(*refs):
        x_ref = refs[0]
        o_ref = refs[1 + n_layers * per]
        h = x_ref[...]
        for li in range(n_layers):
            base = 1 + li * per
            if sample:
                wm, wstd, epsw, bm, bstd, epsb = refs[base:base + 6]
                w = wm[...] + epsw[...] * wstd[...]
                b = bm[...] + epsb[...] * bstd[...]
            else:
                wm, bm = refs[base:base + 2]
                w = wm[...]
                b = bm[...]
            h = jnp.dot(h, w, preferred_element_type=jnp.float32) + b
            if li < n_layers - 1:
                h = jnp.maximum(h, 0.0)
        o_ref[...] = h.astype(o_ref.dtype)

    return kernel


def _forward_fused(x_p, prepared, eps, sample, *, tb_cap=256):
    bp = x_p.shape[0]
    tb = _pick_batch_tile(bp, tb_cap)
    grid = (bp // tb,)
    n_layers = len(prepared)

    const2 = lambda i: (0, 0)   # params/eps resident across all batch tiles
    in_specs = [pl.BlockSpec((tb, prepared[0]["kp"]), lambda i: (i, 0))]
    inputs = [x_p]
    for li, p in enumerate(prepared):
        if sample:
            layer_inputs = [p["wm_t"], p["wstd_t"], eps[li][0],
                            p["bm"], p["bstd"], eps[li][1]]
        else:
            layer_inputs = [p["wm_t"], p["bm"]]
        for a in layer_inputs:
            in_specs.append(pl.BlockSpec(a.shape, const2))
            inputs.append(a)

    np_last = prepared[-1]["np"]
    out_shape = jax.ShapeDtypeStruct((bp, np_last), x_p.dtype)
    out_spec = pl.BlockSpec((tb, np_last), lambda i: (i, 0))

    kernel = _make_fused_kernel(n_layers, sample)
    return pl.pallas_call(
        kernel,
        out_shape=out_shape,
        grid=grid,
        in_specs=in_specs,
        out_specs=out_spec,
        compiler_params=pltpu.CompilerParams(
            dimension_semantics=("parallel",)),
    )(*inputs)


def _fused_footprint_bytes(prepared, bp, sample):
    streams = 3 if sample else 1
    total = bp * prepared[0]["kp"] * 4 + bp * prepared[-1]["np"] * 4
    for p in prepared:
        total += streams * (p["kp"] * p["np"] + p["np"]) * 4
        total += bp * p["np"] * 4          # intermediate activation value
    return 2 * total                       # double-buffering headroom


# ---------------------------------------------------------------------------
# Per-layer tiled fallback (for nets too big to keep resident in VMEM).
# ---------------------------------------------------------------------------
def _tiled_sample_kernel(x_ref, wm_ref, wstd_ref, epsw_ref, bm_ref, bstd_ref,
                         epsb_ref, o_ref, acc_ref, *, apply_relu):
    k = pl.program_id(1)
    nk = pl.num_programs(1)

    @pl.when(k == 0)
    def _():
        acc_ref[...] = jnp.zeros_like(acc_ref)

    w = wm_ref[...] + epsw_ref[...] * wstd_ref[...]
    acc_ref[...] += jnp.dot(x_ref[...], w, preferred_element_type=jnp.float32)

    @pl.when(k == nk - 1)
    def _():
        b = bm_ref[...] + epsb_ref[...] * bstd_ref[...]
        y = acc_ref[...] + b
        if apply_relu:
            y = jnp.maximum(y, 0.0)
        o_ref[...] = y.astype(o_ref.dtype)


def _tiled_det_kernel(x_ref, wm_ref, bm_ref, o_ref, acc_ref, *, apply_relu):
    k = pl.program_id(1)
    nk = pl.num_programs(1)

    @pl.when(k == 0)
    def _():
        acc_ref[...] = jnp.zeros_like(acc_ref)

    acc_ref[...] += jnp.dot(x_ref[...], wm_ref[...],
                            preferred_element_type=jnp.float32)

    @pl.when(k == nk - 1)
    def _():
        y = acc_ref[...] + bm_ref[...]
        if apply_relu:
            y = jnp.maximum(y, 0.0)
        o_ref[...] = y.astype(o_ref.dtype)


def _linear_tiled(x_p, p, eps_pair, *, sample, apply_relu,
                  tn_cap=256, tk_cap=512):
    bp, kp = x_p.shape
    assert kp == p["kp"]
    np_ = p["np"]
    tn = _pick_tile(np_, tn_cap)
    tk = _pick_tile(kp, tk_cap)
    grid = (np_ // tn, kp // tk)
    out_shape = jax.ShapeDtypeStruct((bp, np_), x_p.dtype)

    # TODO(synk): for large-batch use, keep x VMEM-resident across the N axis
    # (it currently re-streams its K slab once per N tile).
    x_spec = pl.BlockSpec((bp, tk), lambda i, k: (0, k))
    w_spec = pl.BlockSpec((tk, tn), lambda i, k: (k, i))
    b_spec = pl.BlockSpec((1, tn), lambda i, k: (0, i))
    out_spec = pl.BlockSpec((bp, tn), lambda i, k: (0, i))
    cparams = pltpu.CompilerParams(
        dimension_semantics=("parallel", "arbitrary"))
    scratch = [pltpu.VMEM((bp, tn), jnp.float32)]

    if sample:
        eps_w, eps_b = eps_pair
        kernel = functools.partial(_tiled_sample_kernel, apply_relu=apply_relu)
        return pl.pallas_call(
            kernel, out_shape=out_shape, grid=grid,
            in_specs=[x_spec, w_spec, w_spec, w_spec, b_spec, b_spec, b_spec],
            out_specs=out_spec, scratch_shapes=scratch,
            compiler_params=cparams,
        )(x_p, p["wm_t"], p["wstd_t"], eps_w, p["bm"], p["bstd"], eps_b)

    kernel = functools.partial(_tiled_det_kernel, apply_relu=apply_relu)
    return pl.pallas_call(
        kernel, out_shape=out_shape, grid=grid,
        in_specs=[x_spec, w_spec, b_spec],
        out_specs=out_spec, scratch_shapes=scratch,
        compiler_params=cparams,
    )(x_p, p["wm_t"], p["bm"])


# ---------------------------------------------------------------------------
# Full network forward.
# ---------------------------------------------------------------------------
def mfvi_net_forward(x, prepared, *, key=None, sample=True,
                     max_fused_bytes=20 << 20):
    """Pallas-backed forward of MFVI_Net_LaplacePrior (ReLU between layers)."""
    b, in_dim = x.shape
    assert in_dim == prepared[0]["in_dim"]
    bp = _round_up(b, _SUBLANE)
    kp0 = prepared[0]["kp"]
    x_p = jnp.zeros((bp, kp0), jnp.float32).at[:b, :in_dim].set(x)

    eps = None
    if sample:
        if key is None:
            key = jax.random.PRNGKey(0)
        eps = sample_eps(key, prepared)

    if _fused_footprint_bytes(prepared, bp, sample) <= max_fused_bytes:
        out_p = _forward_fused(x_p, prepared, eps, sample)
    else:
        h = x_p
        n_layers = len(prepared)
        for li, p in enumerate(prepared):
            h = _linear_tiled(h, p, eps[li] if sample else None,
                              sample=sample,
                              apply_relu=(li < n_layers - 1))
        out_p = h

    return out_p[:b, :prepared[-1]["out_dim"]]


# ---------------------------------------------------------------------------
# Pure-JAX reference (uses the same eps when provided).
# ---------------------------------------------------------------------------
def _ref_forward(x, raw_params, eps=None):
    h = x
    n = len(raw_params)
    for li, (wm, wlv, bm, blv) in enumerate(raw_params):
        if eps is not None:
            out_dim, in_dim = wm.shape
            eps_w = eps[li][0][:in_dim, :out_dim].T
            eps_b = eps[li][1][0, :out_dim]
            w = wm + eps_w * jnp.exp(0.5 * wlv)
            b = bm + eps_b * jnp.exp(0.5 * blv)
        else:
            w, b = wm, bm
        h = jnp.dot(h, w.T, precision=jax.lax.Precision.HIGHEST) + b
        if li < n - 1:
            h = jnp.maximum(h, 0.0)
    return h


if __name__ == "__main__":
    key = jax.random.PRNGKey(0)
    k_param, k_x, k_eps = jax.random.split(key, 3)

    batch, input_dim, hidden_sizes, output_dim = 8, 32, [64, 64], 16

    raw_params = init_net_params(k_param, input_dim, hidden_sizes, output_dim)
    prepared = prepare_net(raw_params)
    x = jax.random.normal(k_x, (batch, input_dim), jnp.float32)

    tol = dict(atol=5e-4, rtol=5e-4)

    # Deterministic path, fused kernel.
    y_det = jax.block_until_ready(mfvi_net_forward(x, prepared, sample=False))
    y_det_ref = _ref_forward(x, raw_params)
    assert y_det.shape == (batch, output_dim)
    assert jnp.allclose(y_det, y_det_ref, **tol), (
        float(jnp.max(jnp.abs(y_det - y_det_ref))))

    # Deterministic path, forced tiled fallback.
    y_det_t = jax.block_until_ready(
        mfvi_net_forward(x, prepared, sample=False, max_fused_bytes=0))
    assert jnp.allclose(y_det_t, y_det_ref, **tol)

    # Sampled path, fused kernel: compare against eps-matched JAX reference.
    y_s = jax.block_until_ready(
        mfvi_net_forward(x, prepared, key=k_eps, sample=True))
    eps = sample_eps(k_eps, prepared)
    y_s_ref = _ref_forward(x, raw_params, eps=eps)
    assert y_s.shape == (batch, output_dim)
    assert bool(jnp.all(jnp.isfinite(y_s)))
    assert jnp.allclose(y_s, y_s_ref, **tol), (
        float(jnp.max(jnp.abs(y_s - y_s_ref))))

    # Reproducibility (same key) and key-dependence (new key).
    y_s_b = jax.block_until_ready(
        mfvi_net_forward(x, prepared, key=k_eps, sample=True))
    assert jnp.allclose(y_s, y_s_b)
    y_s_2 = jax.block_until_ready(
        mfvi_net_forward(x, prepared, key=jax.random.fold_in(k_eps, 7),
                         sample=True))
    assert not jnp.allclose(y_s, y_s_2)

    # Sampled path, forced tiled fallback matches the same reference.
    y_s_t = jax.block_until_ready(
        mfvi_net_forward(x, prepared, key=k_eps, sample=True,
                         max_fused_bytes=0))
    assert jnp.allclose(y_s_t, y_s_ref, **tol)

    print("KERNEL_OK")
</pallas_src>

<mosaic_0001>
module attributes {stable_mosaic.version = 11 : i64} {
  func.func @kernel(%arg0: i32, %arg1: memref<8x128xf32, #tpu.memory_space<vmem>>, %arg2: memref<128x128xf32, #tpu.memory_space<vmem>>, %arg3: memref<1x128xf32, #tpu.memory_space<vmem>>, %arg4: memref<128x128xf32, #tpu.memory_space<vmem>>, %arg5: memref<1x128xf32, #tpu.memory_space<vmem>>, %arg6: memref<128x128xf32, #tpu.memory_space<vmem>>, %arg7: memref<1x128xf32, #tpu.memory_space<vmem>>, %arg8: memref<8x128xf32, #tpu.memory_space<vmem>>) attributes {dimension_semantics = [#tpu.dimension_semantics<parallel>], iteration_bounds = array<i64: 1>, scalar_prefetch = 0 : i64, scratch_operands = 0 : i64, tpu.core_type = #tpu.core_type<tc>, window_params = [{transform_indices = @transform_0, window_bounds = array<i64: 8, 128>}, {pipeline_mode = #tpu.pipeline_mode<synchronous>, transform_indices = @transform_1, window_bounds = array<i64: 128, 128>}, {pipeline_mode = #tpu.pipeline_mode<synchronous>, transform_indices = @transform_2, window_bounds = array<i64: 1, 128>}, {pipeline_mode = #tpu.pipeline_mode<synchronous>, transform_indices = @transform_3, window_bounds = array<i64: 128, 128>}, {pipeline_mode = #tpu.pipeline_mode<synchronous>, transform_indices = @transform_4, window_bounds = array<i64: 1, 128>}, {pipeline_mode = #tpu.pipeline_mode<synchronous>, transform_indices = @transform_5, window_bounds = array<i64: 128, 128>}, {pipeline_mode = #tpu.pipeline_mode<synchronous>, transform_indices = @transform_6, window_bounds = array<i64: 1, 128>}, {transform_indices = @transform_7, window_bounds = array<i64: 8, 128>}]} {
    %c0 = arith.constant 0 : index
    %c0_0 = arith.constant 0 : index
    %0 = vector.load %arg1[%c0, %c0_0] : memref<8x128xf32, #tpu.memory_space<vmem>>, vector<8x128xf32>
    %c0_1 = arith.constant 0 : index
    %c0_2 = arith.constant 0 : index
    %1 = vector.load %arg2[%c0_1, %c0_2] : memref<128x128xf32, #tpu.memory_space<vmem>>, vector<128x128xf32>
    %c0_3 = arith.constant 0 : index
    %c0_4 = arith.constant 0 : index
    %2 = vector.load %arg3[%c0_3, %c0_4] : memref<1x128xf32, #tpu.memory_space<vmem>>, vector<1x128xf32>
    %cst = arith.constant dense<0.000000e+00> : vector<8x128xf32>
    %3 = tpu.matmul %0, %1, %cst {dimension_numbers = #tpu.dot_dimension_numbers<[1], [0], [0], [1], [0, 0, 1, 1], [], []>} : vector<8x128xf32>, vector<128x128xf32>, vector<8x128xf32> -> vector<8x128xf32>
    %4 = vector.broadcast %2 : vector<1x128xf32> to vector<8x128xf32>
    %5 = arith.addf %3, %4 : vector<8x128xf32>
    %cst_5 = arith.constant 0.000000e+00 : f32
    %6 = vector.broadcast %cst_5 : f32 to vector<8x128xf32>
    %7 = arith.maximumf %5, %6 : vector<8x128xf32>
    %c0_6 = arith.constant 0 : index
    %c0_7 = arith.constant 0 : index
    %8 = vector.load %arg4[%c0_6, %c0_7] : memref<128x128xf32, #tpu.memory_space<vmem>>, vector<128x128xf32>
    %c0_8 = arith.constant 0 : index
    %c0_9 = arith.constant 0 : index
    %9 = vector.load %arg5[%c0_8, %c0_9] : memref<1x128xf32, #tpu.memory_space<vmem>>, vector<1x128xf32>
    %cst_10 = arith.constant dense<0.000000e+00> : vector<8x128xf32>
    %10 = tpu.matmul %7, %8, %cst_10 {dimension_numbers = #tpu.dot_dimension_numbers<[1], [0], [0], [1], [0, 0, 1, 1], [], []>} : vector<8x128xf32>, vector<128x128xf32>, vector<8x128xf32> -> vector<8x128xf32>
    %11 = vector.broadcast %9 : vector<1x128xf32> to vector<8x128xf32>
    %12 = arith.addf %10, %11 : vector<8x128xf32>
    %cst_11 = arith.constant 0.000000e+00 : f32
    %13 = vector.broadcast %cst_11 : f32 to vector<8x128xf32>
    %14 = arith.maximumf %12, %13 : vector<8x128xf32>
    %c0_12 = arith.constant 0 : index
    %c0_13 = arith.constant 0 : index
    %15 = vector.load %arg6[%c0_12, %c0_13] : memref<128x128xf32, #tpu.memory_space<vmem>>, vector<128x128xf32>
    %c0_14 = arith.constant 0 : index
    %c0_15 = arith.constant 0 : index
    %16 = vector.load %arg7[%c0_14, %c0_15] : memref<1x128xf32, #tpu.memory_space<vmem>>, vector<1x128xf32>
    %cst_16 = arith.constant dense<0.000000e+00> : vector<8x128xf32>
    %17 = tpu.matmul %14, %15, %cst_16 {dimension_numbers = #tpu.dot_dimension_numbers<[1], [0], [0], [1], [0, 0, 1, 1], [], []>} : vector<8x128xf32>, vector<128x128xf32>, vector<8x128xf32> -> vector<8x128xf32>
    %18 = vector.broadcast %16 : vector<1x128xf32> to vector<8x128xf32>
    %19 = arith.addf %17, %18 : vector<8x128xf32>
    %c0_17 = arith.constant 0 : index
    %c0_18 = arith.constant 0 : index
    %20 = vector.load %arg8[%c0_17, %c0_18] : memref<8x128xf32, #tpu.memory_space<vmem>>, vector<8x128xf32>
    tpu.vector_store %arg8[%c0_17, %c0_18], %19 {strides = array<i32>} : memref<8x128xf32, #tpu.memory_space<vmem>>, vector<8x128xf32>,
    return
  }
  func.func @transform_0(%arg0: i32) -> (i32, i32) {
    %c0_i32 = arith.constant 0 : i32
    %c0_i32_0 = arith.constant 0 : i32
    return %arg0, %c0_i32 : i32, i32
  }
  func.func @transform_1(%arg0: i32) -> (i32, i32) {
    %c0_i32 = arith.constant 0 : i32
    %c0_i32_0 = arith.constant 0 : i32
    %c0_i32_1 = arith.constant 0 : i32
    return %c0_i32, %c0_i32_0 : i32, i32
  }
  func.func @transform_2(%arg0: i32) -> (i32, i32) {
    %c0_i32 = arith.constant 0 : i32
    %c0_i32_0 = arith.constant 0 : i32
    %c0_i32_1 = arith.constant 0 : i32
    return %c0_i32, %c0_i32_0 : i32, i32
  }
  func.func @transform_3(%arg0: i32) -> (i32, i32) {
    %c0_i32 = arith.constant 0 : i32
    %c0_i32_0 = arith.constant 0 : i32
    %c0_i32_1 = arith.constant 0 : i32
    return %c0_i32, %c0_i32_0 : i32, i32
  }
  func.func @transform_4(%arg0: i32) -> (i32, i32) {
    %c0_i32 = arith.constant 0 : i32
    %c0_i32_0 = arith.constant 0 : i32
    %c0_i32_1 = arith.constant 0 : i32
    return %c0_i32, %c0_i32_0 : i32, i32
  }
  func.func @transform_5(%arg0: i32) -> (i32, i32) {
    %c0_i32 = arith.constant 0 : i32
    %c0_i32_0 = arith.constant 0 : i32
    %c0_i32_1 = arith.constant 0 : i32
    return %c0_i32, %c0_i32_0 : i32, i32
  }
  func.func @transform_6(%arg0: i32) -> (i32, i32) {
    %c0_i32 = arith.constant 0 : i32
    %c0_i32_0 = arith.constant 0 : i32
    %c0_i32_1 = arith.constant 0 : i32
    return %c0_i32, %c0_i32_0 : i32, i32
  }
  func.func @transform_7(%arg0: i32) -> (i32, i32) {
    %c0_i32 = arith.constant 0 : i32
    %c0_i32_0 = arith.constant 0 : i32
    return %arg0, %c0_i32 : i32, i32
  }
}

</mosaic_0001>

<bundles_post_ra>
// kernel: tpu_custom_call.1
= control target key start
LH: loop header
LB: loop body
LE: loop exit
PB: predicated region body
PF: predicated region fallthrough
CT: control target
= control target key end

     0   :  { %12 = vsyncpa [#allocation3], 0  ;;  %s440_s0 = inlined_call_operand.hbm [shape: f32[8,128], index: 0, kind: input, shape index: {}]   ;;  %s441_s1 = inlined_call_operand.hbm [shape: f32[128,128], index: 1, kind: input, shape index: {}]   ;;  %s442_s2 = inlined_call_operand.vmem [shape: f32[1,128], index: 2, kind: input, shape index: {}]   ;;  %s443_s3 = inlined_call_operand.hbm [shape: f32[128,128], index: 3, kind: input, shape index: {}]   ;;  %s444_s4 = inlined_call_operand.vmem [shape: f32[1,128], index: 4, kind: input, shape index: {}]   ;;  %s445_s5 = inlined_call_operand.hbm [shape: f32[128,128], index: 5, kind: input, shape index: {}]   ;;  %s446_s6 = inlined_call_operand.vmem [shape: f32[1,128], index: 6, kind: input, shape index: {}]   ;;  %s447_s7 = inlined_call_operand.hbm [shape: f32[8,128], index: 7, kind: output, shape index: {}]  }
   0x1   :  { %13 = vsyncpa [#allocation6], 0 }
   0x2   :  { %14 = vsyncpa [#allocation9], 0  ;;  %s31_s26 = sshll.u32 %s441_s1, 4  ;;  %s32_s26 = int_to_ptr.hbm [resolvable:$true] %s31_s26 }
   0x3   :  { %15 = vsyncpa [#allocation4], 0  ;;  %s369_s27 = smov [#allocation5]   ;;  %s21_s8 = sshll.u32 %s440_s0, 4  ;;  %s22_s8 = int_to_ptr.hbm [resolvable:$true] %s21_s8 }
   0x4   :  { %s33_s28 = sshll.u32 %s369_s27, 4  ;;  %s370_s9 = smov 128   ;;  %s34_s28 = int_to_ptr.vmem [resolvable:$true] %s33_s28 }
   0x5   :  { %s371_s10 = smov 8   ;;  %s372_s11 = smov [#allocation2]  }
   0x6   :  { %39 = dma.hbm_to_vmem [thread:$0]  %s32_s26, 2048, %s34_s28, [#allocation6], %s370_s9, %s370_s9, %s371_s10  }
   0x7   :  { %s23_s12 = sshll.u32 %s372_s11, 4  ;;  %s46_s15 = sshll.u32 %s443_s3, 4  ;;  %s24_s12 = int_to_ptr.vmem [resolvable:$true] %s23_s12  ;;  %s47_s15 = int_to_ptr.hbm [resolvable:$true] %s46_s15 }
   0x8   :  { %26 = dma.hbm_to_vmem [thread:$0]  %s22_s8, 128, %s24_s12, [#allocation3]  }
   0x9   :  { %s61_s17 = sshll.u32 %s445_s5, 4  ;;  %s373_s18 = smov [#allocation7]   ;;  %s62_s17 = int_to_ptr.hbm [resolvable:$true] %s61_s17 }
   0xa   :  { %s48_s19 = sshll.u32 %s373_s18, 4  ;;  %s374_s0 = smov [#allocation8]   ;;  %s49_s19 = int_to_ptr.vmem [resolvable:$true] %s48_s19 }
   0xb   :  { %54 = dma.hbm_to_vmem [thread:$0]  %s47_s15, 2048, %s49_s19, [#allocation6], %s370_s9, %s370_s9, %s371_s10  }
   0xc   :  { %s63_s20 = sshll.u32 %s374_s0, 4  ;;  %s64_s20 = int_to_ptr.vmem [resolvable:$true] %s63_s20 }
   0xd   :  { %69 = dma.hbm_to_vmem [thread:$0]  %s62_s17, 2048, %s64_s20, [#allocation9], %s370_s9, %s370_s9, %s371_s10  }
   0xe   :  { %361 = dma.done.wait [#allocation3], 128  }
   0xf   :  { %362 = vsyncadd [#allocation3], 4294967168 }
  0x10   :  { %363 = dma.done.wait [#allocation6], 4096  }
  0x11   :  { %364 = vsyncadd [#allocation6], 4294963200 }
  0x12   :  { %365 = dma.done.wait [#allocation9], 2048  }
  0x13   :  { %366 = vsyncadd [#allocation9], 4294965248  ;;  %v104_v0 = vld [vmem:[#allocation5 + $0x78] sm:$0xff]  ;;  %v103_v1 = vld [vmem:[#allocation5 + $0x70] sm:$0xff]  ;;  %s375_s24 = smov [#allocation10]   ;;  %s219_s28 = sshll.u32 %s447_s7, 4  ;;  %s220_s28 = int_to_ptr.hbm [resolvable:$true] %s219_s28 }
  0x14   :  { %109 = vmatpush.msra.mxu0 %v104_v0  ;;  %v102_v2 = vld [vmem:[#allocation5 + $0x68] sm:$0xff]  ;;  %v101_v3 = vld [vmem:[#allocation5 + $0x60] sm:$0xff]  ;;  %v145_v4 = vld [vmem:[#allocation7 + $0x78] sm:$0xff]  ;;  %s217_s25 = sshll.u32 %s375_s24, 4  ;;  %s218_s25 = int_to_ptr.vmem [resolvable:$true] %s217_s25 }
  0x15   :  { %v100_v5 = vld [vmem:[#allocation5 + $0x58] sm:$0xff]  ;;  %150 = vmatpush.msra.mxu1 %v145_v4  ;;  %v144_v6 = vld [vmem:[#allocation7 + $0x70] sm:$0xff]  ;;  %v143_v7 = vld [vmem:[#allocation7 + $0x68] sm:$0xff] }
  0x16   :  { %110 = vmatpush.msra.mxu0 %v103_v1  ;;  %v99_v8 = vld [vmem:[#allocation5 + $0x50] sm:$0xff]  ;;  %v142_v9 = vld [vmem:[#allocation7 + $0x60] sm:$0xff]  ;;  %v98_v10 = vld [vmem:[#allocation5 + $0x48] sm:$0xff] }
  0x17   :  { %151 = vmatpush.msra.mxu1 %v144_v6  ;;  %v141_v11 = vld [vmem:[#allocation7 + $0x58] sm:$0xff]  ;;  %v97_v12 = vld [vmem:[#allocation5 + $0x40] sm:$0xff]  ;;  %v140_v13 = vld [vmem:[#allocation7 + $0x50] sm:$0xff] }
  0x18   :  { %111 = vmatpush.msra.mxu0 %v102_v2  ;;  %v96_v14 = vld [vmem:[#allocation5 + $0x38] sm:$0xff]  ;;  %v139_v15 = vld [vmem:[#allocation7 + $0x48] sm:$0xff]  ;;  %v95_v16 = vld [vmem:[#allocation5 + $0x30] sm:$0xff] }
  0x19   :  { %152 = vmatpush.msra.mxu1 %v143_v7  ;;  %v138_v17 = vld [vmem:[#allocation7 + $0x40] sm:$0xff]  ;;  %v94_v18 = vld [vmem:[#allocation5 + $0x28] sm:$0xff]  ;;  %v137_v19 = vld [vmem:[#allocation7 + $0x38] sm:$0xff] }
  0x1a   :  { %112 = vmatpush.msra.mxu0 %v101_v3  ;;  %v93_v20 = vld [vmem:[#allocation5 + $0x20] sm:$0xff]  ;;  %v136_v21 = vld [vmem:[#allocation7 + $0x30] sm:$0xff]  ;;  %v92_v22 = vld [vmem:[#allocation5 + $0x18] sm:$0xff] }
  0x1b   :  { %153 = vmatpush.msra.mxu1 %v142_v9  ;;  %v135_v23 = vld [vmem:[#allocation7 + $0x28] sm:$0xff]  ;;  %v91_v24 = vld [vmem:[#allocation5 + $0x10] sm:$0xff]  ;;  %v134_v25 = vld [vmem:[#allocation7 + $0x20] sm:$0xff] }
  0x1c   :  { %113 = vmatpush.msra.mxu0 %v100_v5  ;;  %v90_v26 = vld [vmem:[#allocation5 + $0x8] sm:$0xff]  ;;  %v133_v27 = vld [vmem:[#allocation7 + $0x18] sm:$0xff]  ;;  %v89_v28 = vld [vmem:[#allocation5] sm:$0xff] }
  0x1d   :  { %154 = vmatpush.msra.mxu1 %v141_v11  ;;  %v88_v29 = vld [vmem:[#allocation2] sm:$0xff]  ;;  %v132_v30 = vld [vmem:[#allocation7 + $0x10] sm:$0xff]  ;;  %v131_v31 = vld [vmem:[#allocation7 + $0x8] sm:$0xff] }
  0x1e   :  { %114 = vmatpush.msra.mxu0 %v99_v8  ;;  %v130_v32 = vld [vmem:[#allocation7] sm:$0xff]  ;;  %v186_v33 = vld [vmem:[#allocation8 + $0x78] sm:$0xff]  ;;  %v185_v34 = vld [vmem:[#allocation8 + $0x70] sm:$0xff] }
  0x1f   :  { %155 = vmatpush.msra.mxu1 %v140_v13  ;;  %191 = vmatpush.msra.mxu2 %v186_v33  ;;  %v184_v35 = vld [vmem:[#allocation8 + $0x68] sm:$0xff]  ;;  %v183_v36 = vld [vmem:[#allocation8 + $0x60] sm:$0xff]  ;;  %v182_v37 = vld [vmem:[#allocation8 + $0x58] sm:$0xff] }
  0x20   :  { %115 = vmatpush.msra.mxu0 %v98_v10  ;;  %v181_v38 = vld [vmem:[#allocation8 + $0x50] sm:$0xff]  ;;  %v180_v39 = vld [vmem:[#allocation8 + $0x48] sm:$0xff]  ;;  %v179_v40 = vld [vmem:[#allocation8 + $0x40] sm:$0xff] }
  0x21   :  { %156 = vmatpush.msra.mxu1 %v139_v15  ;;  %192 = vmatpush.msra.mxu2 %v185_v34  ;;  %v178_v41 = vld [vmem:[#allocation8 + $0x38] sm:$0xff]  ;;  %v177_v42 = vld [vmem:[#allocation8 + $0x30] sm:$0xff]  ;;  %v176_v43 = vld [vmem:[#allocation8 + $0x28] sm:$0xff] }
  0x22   :  { %116 = vmatpush.msra.mxu0 %v97_v12  ;;  %v175_v44 = vld [vmem:[#allocation8 + $0x20] sm:$0xff]  ;;  %v174_v45 = vld [vmem:[#allocation8 + $0x18] sm:$0xff]  ;;  %v173_v50 = vld [vmem:[#allocation8 + $0x10] sm:$0xff] }
  0x23   :  { %157 = vmatpush.msra.mxu1 %v138_v17  ;;  %193 = vmatpush.msra.mxu2 %v184_v35  ;;  %v238_v46 = vld [vmem:[%s442_s2] ss:$0 sm:$0xff]  ;;  %v172_v51 = vld [vmem:[#allocation8 + $0x8] sm:$0xff]  ;;  %v171_v52 = vld [vmem:[#allocation8] sm:$0xff] }
  0x24   :  { %117 = vmatpush.msra.mxu0 %v96_v14  ;;  %v239_v53 = vld [vmem:[%s444_s4] ss:$0 sm:$0xff] }
  0x25   :  { %158 = vmatpush.msra.mxu1 %v137_v19  ;;  %194 = vmatpush.msra.mxu2 %v183_v36  ;;  %v240_v57 = vld [vmem:[%s446_s6] ss:$0 sm:$0xff] }
  0x26   :  { %118 = vmatpush.msra.mxu0 %v95_v16 }
  0x27   :  { %159 = vmatpush.msra.mxu1 %v136_v21  ;;  %195 = vmatpush.msra.mxu2 %v182_v37 }
  0x28   :  { %119 = vmatpush.msra.mxu0 %v94_v18 }
  0x29   :  { %160 = vmatpush.msra.mxu1 %v135_v23  ;;  %196 = vmatpush.msra.mxu2 %v181_v38 }
  0x2a   :  { %120 = vmatpush.msra.mxu0 %v93_v20 }
  0x2b   :  { %161 = vmatpush.msra.mxu1 %v134_v25  ;;  %197 = vmatpush.msra.mxu2 %v180_v39 }
  0x2c   :  { %121 = vmatpush.msra.mxu0 %v92_v22 }
  0x2d   :  { %162 = vmatpush.msra.mxu1 %v133_v27  ;;  %198 = vmatpush.msra.mxu2 %v179_v40 }
  0x2e   :  { %122 = vmatpush.msra.mxu0 %v91_v24 }
  0x2f   :  { %163 = vmatpush.msra.mxu1 %v132_v30  ;;  %199 = vmatpush.msra.mxu2 %v178_v41 }
  0x30   :  { %123 = vmatpush.msra.mxu0 %v90_v26 }
  0x31   :  { %164 = vmatpush.msra.mxu1 %v131_v31  ;;  %200 = vmatpush.msra.mxu2 %v177_v42 }
  0x32   :  { %124 = vmatpush.msra.mxu0 %v89_v28 }
  0x33   :  { %125 = vmatmul.f32.vlgmr.msra.gmra.mxu0 %v88_v29  ;;  %165 = vmatpush.msra.mxu1 %v130_v32 }
  0x34   :  { %201 = vmatpush.msra.mxu2 %v176_v43 }
  0x36   :  { %202 = vmatpush.msra.mxu2 %v175_v44 }
  0x38   :  { %203 = vmatpush.msra.mxu2 %v174_v45 }
  0x3a   :  { %204 = vmatpush.msra.mxu2 %v173_v50 }
  0x3c   :  { %205 = vmatpush.msra.mxu2 %v172_v51 }
  0x3e   :  { %206 = vmatpush.msra.mxu2 %v171_v52 }
  0xb0   :  { %v126_v47 = vpop.f32.mrf.mxu0 }
  0xb1   :  { %v127_v48 = vadd.f32 %v238_v46, %v126_v47 }
  0xb3   :  { %v129_v49 = vmax.f32 %v127_v48, 0.0 }
  0xb5   :  { %166 = vmatmul.f32.vlgmr.msra.gmra.mxu1 %v129_v49 }
 0x132   :  { %v167_v54 = vpop.f32.mrf.mxu1 }
 0x133   :  { %v168_v55 = vadd.f32 %v239_v53, %v167_v54 }
 0x135   :  { %v170_v56 = vmax.f32 %v168_v55, 0.0 }
 0x137   :  { %207 = vmatmul.f32.vlgmr.msra.gmra.mxu2 %v170_v56 }
 0x1ba   :  { %v208_v58 = vpop.f32.mrf.mxu2 }
 0x1bb   :  { %v209_v59 = vadd.f32 %v240_v57, %v208_v58 }
 0x1bd   :  { %211 = vst [vmem:[#allocation10] sm:$0xff] %v209_v59 }
 0x1be   :  { %222 = dma.vmem_to_hbm [thread:$0]  %s218_s25, 128, %s220_s28, [#allocation4]  }
 0x1bf   :  { %367 = dma.done.wait [#allocation4], 128  }
 0x1c0   :  { %368 = vsyncadd [#allocation4], 4294967168 }
 0x1c1   :  { %227 = vsyncpa [#allocation3], 1 }
 0x1c2   :  { %228 = vsyncpa [#allocation6], 1 }
 0x1c3   :  { %229 = vsyncpa [#allocation9], 1 }
 0x1c4   :  { %230 = vsyncpa [#allocation4], 1 }

</bundles_post_ra>
